<compile_context>
chip_gen: v7x
topology: tpu7x:2x2x1
jax: 0.10.0
libtpu: 0.0.40
codegen_flags: <defaults>
</compile_context>

<pallas_src>
import jax
import jax.numpy as jnp
from jax.experimental import pallas as pl
from jax.experimental.pallas import tpu as pltpu


def _round_up(x, m):
    return (x + m - 1) // m * m


# ---------------------------------------------------------------------------
# Kernel 1: one fused GCN layer
#   out = relu( D^-1/2 (A (D^-1/2 H)) W + b ),   padded rows zeroed.
# Grid = (row tiles "parallel", reduction tiles "arbitrary").
# ---------------------------------------------------------------------------
def _gcn_layer_kernel(klo_ref, khi_ref, a_ref, h_ref, w_ref, b_ref,
                      dinv_r_ref, dinv_k_ref, out_ref, acc_ref):
    i = pl.program_id(0)
    k = pl.program_id(1)

    @pl.when(k == 0)
    def _init():
        acc_ref[...] = jnp.zeros_like(acc_ref)

    # Skip tiles that are entirely outside this row-tile's nonzero column band.
    @pl.when((k >= klo_ref[i]) & (k <= khi_ref[i]))
    def _accumulate():
        # Column scaling D^-1/2 applied to the H tile (free VPU work under a
        # mem-bound matmul); MXU consumes bf16 with f32 accumulation.
        h_scaled = (h_ref[...] * dinv_k_ref[...]).astype(jnp.bfloat16)
        acc_ref[...] += jnp.dot(a_ref[...], h_scaled,
                                preferred_element_type=jnp.float32)

    @pl.when(k == pl.num_programs(1) - 1)
    def _finish():
        dinv_r = dinv_r_ref[...]                       # (tm, 1) f32
        pre = acc_ref[...] * dinv_r                    # row scaling D^-1/2
        y = jnp.dot(pre, w_ref[...],
                    preferred_element_type=jnp.float32) + b_ref[...]
        y = jnp.maximum(y, 0.0)
        y = jnp.where(dinv_r > 0.0, y, 0.0)            # zero padded node rows
        out_ref[...] = y.astype(out_ref.dtype)


def _gcn_layer(klo, khi, adj, h_in, w, b, dinv, *, tm, tk):
    n_pad = adj.shape[0]
    d_in = h_in.shape[1]
    d_out = w.shape[1]
    grid = (n_pad // tm, n_pad // tk)

    def _clamp_k(k, klo_ref, khi_ref, i):
        return jnp.maximum(jnp.minimum(k, khi_ref[i]), klo_ref[i])

    def a_map(i, k, klo_ref, khi_ref):
        return (i, _clamp_k(k, klo_ref, khi_ref, i))

    def h_map(i, k, klo_ref, khi_ref):
        return (_clamp_k(k, klo_ref, khi_ref, i), 0)

    flops = 2 * n_pad * n_pad * d_in + 2 * n_pad * d_in * d_out
    bytes_accessed = (adj.size * 2                    # bf16 A (upper bound: full read)
                      + grid[0] * h_in.size * 2       # bf16 H re-read per row tile (upper bound)
                      + n_pad * d_out * 2             # bf16 output
                      + w.size * 4 + b.size * 4 + dinv.size * 8)

    return pl.pallas_call(
        _gcn_layer_kernel,
        out_shape=jax.ShapeDtypeStruct((n_pad, d_out), jnp.bfloat16),
        grid_spec=pltpu.PrefetchScalarGridSpec(
            num_scalar_prefetch=2,
            grid=grid,
            in_specs=[
                pl.BlockSpec((tm, tk), a_map),                              # A (bf16)
                pl.BlockSpec((tk, d_in), h_map),                            # H_{L-1} (bf16)
                pl.BlockSpec((d_in, d_out), lambda i, k, klo, khi: (0, 0)),  # W (f32, resident)
                pl.BlockSpec((1, d_out), lambda i, k, klo, khi: (0, 0)),     # bias (f32)
                pl.BlockSpec((tm, 1), lambda i, k, klo, khi: (i, 0)),        # dinv row slice
                pl.BlockSpec((tk, 1), h_map),                                # dinv col slice
            ],
            out_specs=pl.BlockSpec((tm, d_out), lambda i, k, klo, khi: (i, 0)),
            scratch_shapes=[pltpu.VMEM((tm, d_in), jnp.float32)],
        ),
        compiler_params=pltpu.CompilerParams(
            dimension_semantics=("parallel", "arbitrary"),
            vmem_limit_bytes=32 * 1024 * 1024,
        ),
        cost_estimate=pl.CostEstimate(flops=flops, transcendentals=0,
                                      bytes_accessed=bytes_accessed),
    )(klo, khi, adj, h_in, w, b, dinv, dinv)


# ---------------------------------------------------------------------------
# Kernel 2: fused global mean pool + fc
#   out = ((P @ H) * inv_counts) @ Wfc + bfc      (P = 0/1 membership, bf16)
# ---------------------------------------------------------------------------
def _pool_fc_kernel(p_ref, h_ref, invc_ref, wfc_ref, bfc_ref, out_ref, acc_ref):
    k = pl.program_id(0)

    @pl.when(k == 0)
    def _init():
        acc_ref[...] = jnp.zeros_like(acc_ref)

    acc_ref[...] += jnp.dot(p_ref[...], h_ref[...],
                            preferred_element_type=jnp.float32)

    @pl.when(k == pl.num_programs(0) - 1)
    def _finish():
        pooled = acc_ref[...] * invc_ref[...]          # exact mean in f32
        out_ref[...] = (jnp.dot(pooled, wfc_ref[...],
                                preferred_element_type=jnp.float32)
                        + bfc_ref[...])


def _pool_fc(pool_onehot, h, inv_counts, wfc, bfc, *, tk):
    g, n_pad = pool_onehot.shape
    h_pad = h.shape[1]
    out_dim = wfc.shape[1]
    return pl.pallas_call(
        _pool_fc_kernel,
        out_shape=jax.ShapeDtypeStruct((g, out_dim), jnp.float32),
        grid_spec=pltpu.PrefetchScalarGridSpec(
            num_scalar_prefetch=0,
            grid=(n_pad // tk,),
            in_specs=[
                pl.BlockSpec((g, tk), lambda k: (0, k)),          # P (bf16)
                pl.BlockSpec((tk, h_pad), lambda k: (k, 0)),      # H (bf16)
                pl.BlockSpec((g, 1), lambda k: (0, 0)),           # 1/count (f32)
                pl.BlockSpec((h_pad, out_dim), lambda k: (0, 0)),  # Wfc (f32)
                pl.BlockSpec((1, out_dim), lambda k: (0, 0)),      # bfc (f32)
            ],
            out_specs=pl.BlockSpec((g, out_dim), lambda k: (0, 0)),
            scratch_shapes=[pltpu.VMEM((g, h_pad), jnp.float32)],
        ),
        compiler_params=pltpu.CompilerParams(
            dimension_semantics=("arbitrary",),
            vmem_limit_bytes=32 * 1024 * 1024,
        ),
    )(pool_onehot, h, inv_counts, wfc, bfc)


# ---------------------------------------------------------------------------
# Forward pass (wrapper: O(E)/O(N) glue + 3 fused layer calls + pool/fc call)
# ---------------------------------------------------------------------------
def protein_dna_gnn_forward(x, edge_index, batch, params, num_graphs):
    w1, b1, w2, b2, w3, b3, wfc, bfc = params
    n, in_ch = x.shape
    hidden = w1.shape[1]

    c_pad = _round_up(in_ch, 128)
    h_pad = _round_up(hidden, 128)

    # Tile selection: n_pad divisible by both tm and tk; >= 2 row tiles so both
    # v7x TensorCores get work on the "parallel" axis.
    n_pad0 = _round_up(max(n, 1), 128)
    if n_pad0 >= 1024:
        tm, tk = 512, 1024
        n_pad = _round_up(n, 1024)
    else:
        tk = n_pad0
        tm = max(n_pad0 // 2, 8)
        n_pad = n_pad0
    assert n_pad % tm == 0 and n_pad % tk == 0
    num_rt = n_pad // tm

    # --- glue: raw adjacency with self loops built directly in bf16 (single
    #     N^2 pass); degree / D^-1/2 computed from the edge list (O(E)).  The
    #     symmetric normalization happens inside the kernel.
    src = edge_index[0].astype(jnp.int32)
    dst = edge_index[1].astype(jnp.int32)
    loop = jnp.arange(n, dtype=jnp.int32)
    src_all = jnp.concatenate([src, loop])
    dst_all = jnp.concatenate([dst, loop])
    adj = jnp.zeros((n_pad, n_pad), jnp.bfloat16).at[dst_all, src_all].add(
        jnp.ones(dst_all.shape, jnp.bfloat16))
    deg = jnp.zeros((n_pad,), jnp.float32).at[dst_all].add(1.0)
    dinv = jnp.where(deg > 0, jax.lax.rsqrt(deg), 0.0).reshape(n_pad, 1)

    # --- per-row-tile nonzero column-tile ranges (block-diagonal skip), SMEM-prefetched
    rt = dst_all // tm
    col_lo = jnp.full((num_rt,), n_pad - 1, jnp.int32).at[rt].min(src_all)
    col_hi = jnp.zeros((num_rt,), jnp.int32).at[rt].max(src_all)
    klo = (col_lo // tk).astype(jnp.int32)
    khi = (col_hi // tk).astype(jnp.int32)

    # --- pad params so feature dims are lane-dense (zero-padding is exact) ---
    w1p = jnp.pad(w1, ((0, c_pad - in_ch), (0, h_pad - hidden)))
    w2p = jnp.pad(w2, ((0, h_pad - hidden), (0, h_pad - hidden)))
    w3p = jnp.pad(w3, ((0, h_pad - hidden), (0, h_pad - hidden)))
    b1p = jnp.pad(b1, ((0, 0), (0, h_pad - hidden)))
    b2p = jnp.pad(b2, ((0, 0), (0, h_pad - hidden)))
    b3p = jnp.pad(b3, ((0, 0), (0, h_pad - hidden)))
    wfcp = jnp.pad(wfc, ((0, h_pad - hidden), (0, 0)))

    # --- node features: the only wrapper-side N-sized op left is this pad+cast
    h = jnp.pad(x, ((0, n_pad - n), (0, c_pad - in_ch))).astype(jnp.bfloat16)

    # --- three fused GCN layers (A-propagation + D^-1/2 + W + bias + ReLU) ---
    h = _gcn_layer(klo, khi, adj, h, w1p, b1p, dinv, tm=tm, tk=tk)
    h = _gcn_layer(klo, khi, adj, h, w2p, b2p, dinv, tm=tm, tk=tk)
    h = _gcn_layer(klo, khi, adj, h, w3p, b3p, dinv, tm=tm, tk=tk)

    # --- fused global mean pool + fc ---
    counts = jnp.zeros((num_graphs,), jnp.float32).at[batch].add(1.0)
    inv_counts = (1.0 / jnp.maximum(counts, 1.0)).reshape(num_graphs, 1)
    batch_pad = jnp.concatenate(
        [batch.astype(jnp.int32), jnp.full((n_pad - n,), num_graphs, jnp.int32)])
    pool_onehot = (batch_pad[None, :] ==
                   jnp.arange(num_graphs, dtype=jnp.int32)[:, None]).astype(jnp.bfloat16)
    return _pool_fc(pool_onehot, h, inv_counts, wfcp, bfc, tk=tk)


def init_params(key, in_channels, hidden_dim, output_dim):
    ks = jax.random.split(key, 8)

    def dense(k, fan_in, fan_out):
        return jax.random.normal(k, (fan_in, fan_out), jnp.float32) * (1.0 / jnp.sqrt(fan_in))

    w1 = dense(ks[0], in_channels, hidden_dim)
    b1 = jnp.zeros((1, hidden_dim), jnp.float32)
    w2 = dense(ks[1], hidden_dim, hidden_dim)
    b2 = jax.random.normal(ks[2], (1, hidden_dim), jnp.float32) * 0.01
    w3 = dense(ks[3], hidden_dim, hidden_dim)
    b3 = jax.random.normal(ks[4], (1, hidden_dim), jnp.float32) * 0.01
    wfc = dense(ks[5], hidden_dim, output_dim)
    bfc = jax.random.normal(ks[6], (1, output_dim), jnp.float32) * 0.01
    return (w1, b1, w2, b2, w3, b3, wfc, bfc)


def _reference(x, edge_index, batch, params, num_graphs):
    # pure-JAX f32 reference of the same math (PyG GCNConv semantics)
    n = x.shape[0]
    src, dst = edge_index[0], edge_index[1]
    loop = jnp.arange(n, dtype=edge_index.dtype)
    src = jnp.concatenate([src, loop]); dst = jnp.concatenate([dst, loop])
    adj = jnp.zeros((n, n), jnp.float32).at[dst, src].add(1.0)
    deg = adj.sum(axis=1)
    dinv = jnp.where(deg > 0, deg ** -0.5, 0.0)
    a_hat = dinv[:, None] * adj * dinv[None, :]
    w1, b1, w2, b2, w3, b3, wfc, bfc = params
    h = jnp.maximum(a_hat @ (x @ w1) + b1, 0.0)
    h = jnp.maximum(a_hat @ (h @ w2) + b2, 0.0)
    h = jnp.maximum(a_hat @ (h @ w3) + b3, 0.0)
    counts = jnp.zeros((num_graphs,), jnp.float32).at[batch].add(1.0)
    onehot = (batch[None, :] == jnp.arange(num_graphs)[:, None]).astype(jnp.float32)
    pooled = (onehot / jnp.maximum(counts[:, None], 1.0)) @ h
    return pooled @ wfc + bfc


if __name__ == "__main__":
    key = jax.random.PRNGKey(0)
    in_channels, hidden_dim, output_dim = 8, 32, 1
    num_nodes, num_graphs = 16, 2

    k_x, k_e, k_p = jax.random.split(key, 3)
    x = jax.random.normal(k_x, (num_nodes, in_channels), jnp.float32)
    # random edges within each graph (graph 0: nodes 0..7, graph 1: nodes 8..15)
    e0 = jax.random.randint(k_e, (2, 20), 0, 8)
    e1 = jax.random.randint(jax.random.fold_in(k_e, 1), (2, 20), 8, 16)
    edge_index = jnp.concatenate([e0, e1], axis=1).astype(jnp.int32)   # [2, E]
    batch = jnp.concatenate([jnp.zeros(8, jnp.int32), jnp.ones(8, jnp.int32)])

    params = init_params(k_p, in_channels, hidden_dim, output_dim)

    fwd = jax.jit(protein_dna_gnn_forward, static_argnums=(4,))
    out = fwd(x, edge_index, batch, params, num_graphs)
    out = jax.block_until_ready(out)

    ref = _reference(x, edge_index, batch, params, num_graphs)
    assert out.shape == (num_graphs, output_dim)
    # bf16 adjacency / activations with f32 accumulation -> loose tolerance
    assert jnp.allclose(out, ref, atol=5e-2, rtol=5e-2), (out, ref)
    print("KERNEL_OK")
</pallas_src>

<mosaic_0001>
module attributes {stable_mosaic.version = 11 : i64} {
  func.func private @main(%arg0: i32) attributes {dimension_semantics = [#tpu.dimension_semantics<core_parallel>], iteration_bounds = array<i64: 2>, tpu.core_type = #tpu.core_type<sc_scalar_subcore>, window_params = []} {
    return
  }
}

module attributes {stable_mosaic.version = 11 : i64} {
  func.func private @main(%arg0: i32) attributes {dimension_semantics = [#tpu.dimension_semantics<core_parallel>], iteration_bounds = array<i64: 2>, tpu.core_type = #tpu.core_type<sc_scalar_subcore>, window_params = []} {
    return
  }
}

module attributes {stable_mosaic.version = 11 : i64} {
  func.func @_pool_fc_kernel(%arg0: i32, %arg1: memref<2x128xbf16, #tpu.memory_space<vmem>>, %arg2: memref<128x128xbf16, #tpu.memory_space<vmem>>, %arg3: memref<2x1xf32, #tpu.memory_space<vmem>>, %arg4: memref<128x1xf32, #tpu.memory_space<vmem>>, %arg5: memref<1x1xf32, #tpu.memory_space<vmem>>, %arg6: memref<2x1xf32, #tpu.memory_space<vmem>>, %arg7: memref<2x128xf32, #tpu.memory_space<vmem>>) attributes {dimension_semantics = [#tpu.dimension_semantics<arbitrary>], iteration_bounds = array<i64: 1>, scalar_prefetch = 0 : i64, scratch_operands = 1 : i64, tpu.core_type = #tpu.core_type<tc>, window_params = [{transform_indices = @transform_0, window_bounds = array<i64: 2, 128>}, {transform_indices = @transform_1, window_bounds = array<i64: 128, 128>}, {pipeline_mode = #tpu.pipeline_mode<synchronous>, transform_indices = @transform_2, window_bounds = array<i64: 2, 1>}, {pipeline_mode = #tpu.pipeline_mode<synchronous>, transform_indices = @transform_3, window_bounds = array<i64: 128, 1>}, {pipeline_mode = #tpu.pipeline_mode<synchronous>, transform_indices = @transform_4, window_bounds = array<i64: 1, 1>}, {pipeline_mode = #tpu.pipeline_mode<synchronous>, transform_indices = @transform_5, window_bounds = array<i64: 2, 1>}]} {
    %c0_i32 = arith.constant 0 : i32
    %0 = arith.cmpi eq, %arg0, %c0_i32 : i32
    %1 = arith.extui %0 : i1 to i32
    %c0_i32_0 = arith.constant 0 : i32
    %2 = arith.cmpi ne, %1, %c0_i32_0 : i32
    scf.if %2 {
      %cst_10 = arith.constant 0.000000e+00 : f32
      %12 = vector.broadcast %cst_10 : f32 to vector<2x128xf32>
      %c0_11 = arith.constant 0 : index
      %c0_12 = arith.constant 0 : index
      %13 = vector.load %arg7[%c0_11, %c0_12] : memref<2x128xf32, #tpu.memory_space<vmem>>, vector<2x128xf32>
      tpu.vector_store %arg7[%c0_11, %c0_12], %12 {strides = array<i32>} : memref<2x128xf32, #tpu.memory_space<vmem>>, vector<2x128xf32>,
    } else {
    }
    %c0 = arith.constant 0 : index
    %c0_1 = arith.constant 0 : index
    %3 = vector.load %arg7[%c0, %c0_1] : memref<2x128xf32, #tpu.memory_space<vmem>>, vector<2x128xf32>
    %c0_2 = arith.constant 0 : index
    %c0_3 = arith.constant 0 : index
    %4 = vector.load %arg1[%c0_2, %c0_3] : memref<2x128xbf16, #tpu.memory_space<vmem>>, vector<2x128xbf16>
    %c0_4 = arith.constant 0 : index
    %c0_5 = arith.constant 0 : index
    %5 = vector.load %arg2[%c0_4, %c0_5] : memref<128x128xbf16, #tpu.memory_space<vmem>>, vector<128x128xbf16>
    %cst = arith.constant dense<0.000000e+00> : vector<2x128xf32>
    %6 = tpu.matmul %4, %5, %cst {dimension_numbers = #tpu.dot_dimension_numbers<[1], [0], [0], [1], [0, 0, 1, 1], [], []>} : vector<2x128xbf16>, vector<128x128xbf16>, vector<2x128xf32> -> vector<2x128xf32>
    %7 = arith.addf %3, %6 : vector<2x128xf32>
    %c0_6 = arith.constant 0 : index
    %c0_7 = arith.constant 0 : index
    %8 = vector.load %arg7[%c0_6, %c0_7] : memref<2x128xf32, #tpu.memory_space<vmem>>, vector<2x128xf32>
    tpu.vector_store %arg7[%c0_6, %c0_7], %7 {strides = array<i32>} : memref<2x128xf32, #tpu.memory_space<vmem>>, vector<2x128xf32>,
    %c0_i32_8 = arith.constant 0 : i32
    %9 = arith.cmpi eq, %arg0, %c0_i32_8 : i32
    %10 = arith.extui %9 : i1 to i32
    %c0_i32_9 = arith.constant 0 : i32
    %11 = arith.cmpi ne, %10, %c0_i32_9 : i32
    scf.if %11 {
      %c0_10 = arith.constant 0 : index
      %c0_11 = arith.constant 0 : index
      %12 = vector.load %arg7[%c0_10, %c0_11] : memref<2x128xf32, #tpu.memory_space<vmem>>, vector<2x128xf32>
      %c0_12 = arith.constant 0 : index
      %c0_13 = arith.constant 0 : index
      %13 = vector.load %arg3[%c0_12, %c0_13] : memref<2x1xf32, #tpu.memory_space<vmem>>, vector<2x1xf32>
      %14 = vector.broadcast %13 : vector<2x1xf32> to vector<2x128xf32>
      %15 = arith.mulf %12, %14 : vector<2x128xf32>
      %c0_14 = arith.constant 0 : index
      %c0_15 = arith.constant 0 : index
      %16 = vector.load %arg4[%c0_14, %c0_15] : memref<128x1xf32, #tpu.memory_space<vmem>>, vector<128x1xf32>
      %cst_16 = arith.constant dense<0.000000e+00> : vector<2x1xf32>
      %17 = tpu.matmul %15, %16, %cst_16 {dimension_numbers = #tpu.dot_dimension_numbers<[1], [0], [0], [1], [0, 0, 1, 1], [], []>} : vector<2x128xf32>, vector<128x1xf32>, vector<2x1xf32> -> vector<2x1xf32>
      %c0_17 = arith.constant 0 : index
      %c0_18 = arith.constant 0 : index
      %18 = vector.load %arg5[%c0_17, %c0_18] : memref<1x1xf32, #tpu.memory_space<vmem>>, vector<1x1xf32>
      %19 = vector.broadcast %18 : vector<1x1xf32> to vector<2x1xf32>
      %20 = arith.addf %17, %19 : vector<2x1xf32>
      %c0_19 = arith.constant 0 : index
      %c0_20 = arith.constant 0 : index
      %21 = vector.load %arg6[%c0_19, %c0_20] : memref<2x1xf32, #tpu.memory_space<vmem>>, vector<2x1xf32>
      tpu.vector_store %arg6[%c0_19, %c0_20], %20 {strides = array<i32>} : memref<2x1xf32, #tpu.memory_space<vmem>>, vector<2x1xf32>,
    } else {
    }
    return
  }
  func.func @transform_0(%arg0: i32) -> (i32, i32) {
    %c0_i32 = arith.constant 0 : i32
    %c0_i32_0 = arith.constant 0 : i32
    return %c0_i32, %arg0 : i32, i32
  }
  func.func @transform_1(%arg0: i32) -> (i32, i32) {
    %c0_i32 = arith.constant 0 : i32
    %c0_i32_0 = arith.constant 0 : i32
    return %arg0, %c0_i32 : i32, i32
  }
  func.func @transform_2(%arg0: i32) -> (i32, i32) {
    %c0_i32 = arith.constant 0 : i32
    %c0_i32_0 = arith.constant 0 : i32
    %c0_i32_1 = arith.constant 0 : i32
    return %c0_i32, %c0_i32_0 : i32, i32
  }
  func.func @transform_3(%arg0: i32) -> (i32, i32) {
    %c0_i32 = arith.constant 0 : i32
    %c0_i32_0 = arith.constant 0 : i32
    %c0_i32_1 = arith.constant 0 : i32
    return %c0_i32, %c0_i32_0 : i32, i32
  }
  func.func @transform_4(%arg0: i32) -> (i32, i32) {
    %c0_i32 = arith.constant 0 : i32
    %c0_i32_0 = arith.constant 0 : i32
    %c0_i32_1 = arith.constant 0 : i32
    return %c0_i32, %c0_i32_0 : i32, i32
  }
  func.func @transform_5(%arg0: i32) -> (i32, i32) {
    %c0_i32 = arith.constant 0 : i32
    %c0_i32_0 = arith.constant 0 : i32
    %c0_i32_1 = arith.constant 0 : i32
    return %c0_i32, %c0_i32_0 : i32, i32
  }
}

module attributes {stable_mosaic.version = 11 : i64} {
  func.func @_gcn_layer_kernel(%arg0: i32, %arg1: i32, %arg2: memref<2xi32, #tpu.memory_space<smem>>, %arg3: memref<2xi32, #tpu.memory_space<smem>>, %arg4: memref<64x128xbf16, #tpu.memory_space<vmem>>, %arg5: memref<128x128xbf16, #tpu.memory_space<vmem>>, %arg6: memref<128x128xf32, #tpu.memory_space<vmem>>, %arg7: memref<1x128xf32, #tpu.memory_space<vmem>>, %arg8: memref<64x1xf32, #tpu.memory_space<vmem>>, %arg9: memref<128x1xf32, #tpu.memory_space<vmem>>, %arg10: memref<64x128xbf16, #tpu.memory_space<vmem>>, %arg11: memref<64x128xf32, #tpu.memory_space<vmem>>) attributes {dimension_semantics = [#tpu.dimension_semantics<parallel>, #tpu.dimension_semantics<arbitrary>], iteration_bounds = array<i64: 2, 1>, scalar_prefetch = 2 : i64, scratch_operands = 1 : i64, tpu.core_type = #tpu.core_type<tc>, window_params = [{transform_indices = @transform_0, window_bounds = array<i64: 64, 128>}, {transform_indices = @transform_1, window_bounds = array<i64: 128, 128>}, {pipeline_mode = #tpu.pipeline_mode<synchronous>, transform_indices = @transform_2, window_bounds = array<i64: 128, 128>}, {pipeline_mode = #tpu.pipeline_mode<synchronous>, transform_indices = @transform_3, window_bounds = array<i64: 1, 128>}, {transform_indices = @transform_4, window_bounds = array<i64: 64, 1>}, {transform_indices = @transform_5, window_bounds = array<i64: 128, 1>}, {transform_indices = @transform_6, window_bounds = array<i64: 64, 128>}]} {
    %c0_i32 = arith.constant 0 : i32
    %0 = arith.cmpi eq, %arg1, %c0_i32 : i32
    %1 = arith.extui %0 : i1 to i32
    %c0_i32_0 = arith.constant 0 : i32
    %2 = arith.cmpi ne, %1, %c0_i32_0 : i32
    scf.if %2 {
      %cst = arith.constant 0.000000e+00 : f32
      %15 = vector.broadcast %cst : f32 to vector<64x128xf32>
      %c0 = arith.constant 0 : index
      %c0_4 = arith.constant 0 : index
      %16 = vector.load %arg11[%c0, %c0_4] : memref<64x128xf32, #tpu.memory_space<vmem>>, vector<64x128xf32>
      tpu.vector_store %arg11[%c0, %c0_4], %15 {strides = array<i32>} : memref<64x128xf32, #tpu.memory_space<vmem>>, vector<64x128xf32>,
    } else {
    }
    %3 = arith.index_cast %arg0 : i32 to index
    %4 = memref.load %arg2[%3] : memref<2xi32, #tpu.memory_space<smem>>
    %5 = arith.cmpi sge, %arg1, %4 : i32
    %6 = arith.index_cast %arg0 : i32 to index
    %7 = memref.load %arg3[%6] : memref<2xi32, #tpu.memory_space<smem>>
    %8 = arith.cmpi sle, %arg1, %7 : i32
    %9 = arith.andi %5, %8 : i1
    %10 = arith.extui %9 : i1 to i32
    %c0_i32_1 = arith.constant 0 : i32
    %11 = arith.cmpi ne, %10, %c0_i32_1 : i32
    scf.if %11 {
      %c0 = arith.constant 0 : index
      %c0_4 = arith.constant 0 : index
      %15 = vector.load %arg5[%c0, %c0_4] : memref<128x128xbf16, #tpu.memory_space<vmem>>, vector<128x128xbf16>
      %c0_5 = arith.constant 0 : index
      %c0_6 = arith.constant 0 : index
      %16 = vector.load %arg9[%c0_5, %c0_6] : memref<128x1xf32, #tpu.memory_space<vmem>>, vector<128x1xf32>
      %17 = arith.extf %15 : vector<128x128xbf16> to vector<128x128xf32>
      %18 = vector.broadcast %16 : vector<128x1xf32> to vector<128x128xf32>
      %19 = arith.mulf %17, %18 : vector<128x128xf32>
      %20 = arith.truncf %19 : vector<128x128xf32> to vector<128x128xbf16>
      %c0_7 = arith.constant 0 : index
      %c0_8 = arith.constant 0 : index
      %21 = vector.load %arg11[%c0_7, %c0_8] : memref<64x128xf32, #tpu.memory_space<vmem>>, vector<64x128xf32>
      %c0_9 = arith.constant 0 : index
      %c0_10 = arith.constant 0 : index
      %22 = vector.load %arg4[%c0_9, %c0_10] : memref<64x128xbf16, #tpu.memory_space<vmem>>, vector<64x128xbf16>
      %cst = arith.constant dense<0.000000e+00> : vector<64x128xf32>
      %23 = tpu.matmul %22, %20, %cst {dimension_numbers = #tpu.dot_dimension_numbers<[1], [0], [0], [1], [0, 0, 1, 1], [], []>} : vector<64x128xbf16>, vector<128x128xbf16>, vector<64x128xf32> -> vector<64x128xf32>
      %24 = arith.addf %21, %23 : vector<64x128xf32>
      %c0_11 = arith.constant 0 : index
      %c0_12 = arith.constant 0 : index
      %25 = vector.load %arg11[%c0_11, %c0_12] : memref<64x128xf32, #tpu.memory_space<vmem>>, vector<64x128xf32>
      tpu.vector_store %arg11[%c0_11, %c0_12], %24 {strides = array<i32>} : memref<64x128xf32, #tpu.memory_space<vmem>>, vector<64x128xf32>,
    } else {
    }
    %c0_i32_2 = arith.constant 0 : i32
    %12 = arith.cmpi eq, %arg1, %c0_i32_2 : i32
    %13 = arith.extui %12 : i1 to i32
    %c0_i32_3 = arith.constant 0 : i32
    %14 = arith.cmpi ne, %13, %c0_i32_3 : i32
    scf.if %14 {
      %c0 = arith.constant 0 : index
      %c0_4 = arith.constant 0 : index
      %15 = vector.load %arg8[%c0, %c0_4] : memref<64x1xf32, #tpu.memory_space<vmem>>, vector<64x1xf32>
      %c0_5 = arith.constant 0 : index
      %c0_6 = arith.constant 0 : index
      %16 = vector.load %arg11[%c0_5, %c0_6] : memref<64x128xf32, #tpu.memory_space<vmem>>, vector<64x128xf32>
      %17 = vector.broadcast %15 : vector<64x1xf32> to vector<64x128xf32>
      %18 = arith.mulf %16, %17 : vector<64x128xf32>
      %c0_7 = arith.constant 0 : index
      %c0_8 = arith.constant 0 : index
      %19 = vector.load %arg6[%c0_7, %c0_8] : memref<128x128xf32, #tpu.memory_space<vmem>>, vector<128x128xf32>
      %cst = arith.constant dense<0.000000e+00> : vector<64x128xf32>
      %20 = tpu.matmul %18, %19, %cst {dimension_numbers = #tpu.dot_dimension_numbers<[1], [0], [0], [1], [0, 0, 1, 1], [], []>} : vector<64x128xf32>, vector<128x128xf32>, vector<64x128xf32> -> vector<64x128xf32>
      %c0_9 = arith.constant 0 : index
      %c0_10 = arith.constant 0 : index
      %21 = vector.load %arg7[%c0_9, %c0_10] : memref<1x128xf32, #tpu.memory_space<vmem>>, vector<1x128xf32>
      %22 = vector.broadcast %21 : vector<1x128xf32> to vector<64x128xf32>
      %23 = arith.addf %20, %22 : vector<64x128xf32>
      %cst_11 = arith.constant 0.000000e+00 : f32
      %24 = vector.broadcast %cst_11 : f32 to vector<64x128xf32>
      %25 = arith.maximumf %23, %24 : vector<64x128xf32>
      %cst_12 = arith.constant 0.000000e+00 : f32
      %26 = vector.broadcast %cst_12 : f32 to vector<64x1xf32>
      %27 = arith.cmpf ogt, %15, %26 : vector<64x1xf32>
      %cst_13 = arith.constant 0.000000e+00 : f32
      %28 = vector.shape_cast %27 : vector<64x1xi1> to vector<64x1xi1>
      %29 = vector.broadcast %28 : vector<64x1xi1> to vector<64x128xi1>
      %30 = vector.broadcast %cst_13 : f32 to vector<64x128xf32>
      %31 = arith.select %29, %25, %30 : vector<64x128xi1>, vector<64x128xf32>
      %32 = arith.truncf %31 : vector<64x128xf32> to vector<64x128xbf16>
      %c0_14 = arith.constant 0 : index
      %c0_15 = arith.constant 0 : index
      %33 = vector.load %arg10[%c0_14, %c0_15] : memref<64x128xbf16, #tpu.memory_space<vmem>>, vector<64x128xbf16>
      tpu.vector_store %arg10[%c0_14, %c0_15], %32 {strides = array<i32>} : memref<64x128xbf16, #tpu.memory_space<vmem>>, vector<64x128xbf16>,
    } else {
    }
    return
  }
  func.func @transform_0(%arg0: i32, %arg1: i32, %arg2: memref<2xi32, #tpu.memory_space<smem>>, %arg3: memref<2xi32, #tpu.memory_space<smem>>) -> (i32, i32) {
    %0 = arith.index_cast %arg0 : i32 to index
    %1 = memref.load %arg3[%0] : memref<2xi32, #tpu.memory_space<smem>>
    %2 = arith.minsi %arg1, %1 : i32
    %3 = arith.index_cast %arg0 : i32 to index
    %4 = memref.load %arg2[%3] : memref<2xi32, #tpu.memory_space<smem>>
    %5 = arith.maxsi %2, %4 : i32
    %c0_i32 = arith.constant 0 : i32
    return %arg0, %5 : i32, i32
  }
  func.func @transform_1(%arg0: i32, %arg1: i32, %arg2: memref<2xi32, #tpu.memory_space<smem>>, %arg3: memref<2xi32, #tpu.memory_space<smem>>) -> (i32, i32) {
    %0 = arith.index_cast %arg0 : i32 to index
    %1 = memref.load %arg3[%0] : memref<2xi32, #tpu.memory_space<smem>>
    %2 = arith.minsi %arg1, %1 : i32
    %3 = arith.index_cast %arg0 : i32 to index
    %4 = memref.load %arg2[%3] : memref<2xi32, #tpu.memory_space<smem>>
    %5 = arith.maxsi %2, %4 : i32
    %c0_i32 = arith.constant 0 : i32
    %c0_i32_0 = arith.constant 0 : i32
    return %5, %c0_i32 : i32, i32
  }
  func.func @transform_2(%arg0: i32, %arg1: i32, %arg2: memref<2xi32, #tpu.memory_space<smem>>, %arg3: memref<2xi32, #tpu.memory_space<smem>>) -> (i32, i32) {
    %c0_i32 = arith.constant 0 : i32
    %c0_i32_0 = arith.constant 0 : i32
    %c0_i32_1 = arith.constant 0 : i32
    return %c0_i32, %c0_i32_0 : i32, i32
  }
  func.func @transform_3(%arg0: i32, %arg1: i32, %arg2: memref<2xi32, #tpu.memory_space<smem>>, %arg3: memref<2xi32, #tpu.memory_space<smem>>) -> (i32, i32) {
    %c0_i32 = arith.constant 0 : i32
    %c0_i32_0 = arith.constant 0 : i32
    %c0_i32_1 = arith.constant 0 : i32
    return %c0_i32, %c0_i32_0 : i32, i32
  }
  func.func @transform_4(%arg0: i32, %arg1: i32, %arg2: memref<2xi32, #tpu.memory_space<smem>>, %arg3: memref<2xi32, #tpu.memory_space<smem>>) -> (i32, i32) {
    %c0_i32 = arith.constant 0 : i32
    %c0_i32_0 = arith.constant 0 : i32
    return %arg0, %c0_i32 : i32, i32
  }
  func.func @transform_5(%arg0: i32, %arg1: i32, %arg2: memref<2xi32, #tpu.memory_space<smem>>, %arg3: memref<2xi32, #tpu.memory_space<smem>>) -> (i32, i32) {
    %0 = arith.index_cast %arg0 : i32 to index
    %1 = memref.load %arg3[%0] : memref<2xi32, #tpu.memory_space<smem>>
    %2 = arith.minsi %arg1, %1 : i32
    %3 = arith.index_cast %arg0 : i32 to index
    %4 = memref.load %arg2[%3] : memref<2xi32, #tpu.memory_space<smem>>
    %5 = arith.maxsi %2, %4 : i32
    %c0_i32 = arith.constant 0 : i32
    %c0_i32_0 = arith.constant 0 : i32
    return %5, %c0_i32 : i32, i32
  }
  func.func @transform_6(%arg0: i32, %arg1: i32, %arg2: memref<2xi32, #tpu.memory_space<smem>>, %arg3: memref<2xi32, #tpu.memory_space<smem>>) -> (i32, i32) {
    %c0_i32 = arith.constant 0 : i32
    %c0_i32_0 = arith.constant 0 : i32
    return %arg0, %c0_i32 : i32, i32
  }
}

</mosaic_0001>

<bundles_post_ra>
// kernel: protein_dna_gnn_forward.7
= control target key start
LH: loop header
LB: loop body
LE: loop exit
PB: predicated region body
PF: predicated region fallthrough
CT: control target
= control target key end

     0   :  { %v373_v0 = vmov 0.0   ;;  %vm374_vm0 = vmmov 0   ;;  %v375_v2 = vmov 0   ;;  %v376_v3 = vmov 0.0|0.0   ;;  %s499_s1 = inlined_call_operand.vmem [shape: bf16[128,128], index: 1, kind: input, shape index: {}]   ;;  %s500_s2 = inlined_call_operand.vmem [shape: f32[2,1], index: 2, kind: input, shape index: {}]   ;;  %s501_s3 = inlined_call_operand.vmem [shape: f32[128,1], index: 3, kind: input, shape index: {}]   ;;  %s502_s0 = inlined_call_operand.vmem [shape: bf16[2,128], index: 0, kind: input, shape index: {}]   ;;  %s503_s4 = inlined_call_operand.<no memory space> [shape: f32[1,1], index: 4, kind: input, shape index: {}]   ;;  %s504_s5 = inlined_call_operand.vmem [shape: f32[2,1], index: 5, kind: output, shape index: {}]  }
   0x1   :  { %281 = vmatprep.subr.bf16.mxu0 %v373_v0  ;;  %27 = vst [vmem:[#allocation2] sm:$0x3] %v373_v0  ;;  %v365_v1 = vld [vmem:[%s499_s1] sm:$0xff]   ;;  %297 = vmatprep.mubr.msk.bf16.mxu0 %vm374_vm0, %v373_v0  ;;  %v366_v4 = vld [vmem:[%s499_s1 + $0x8] sm:$0xff]   ;;  %v367_v5 = vld [vmem:[%s499_s1 + $0x10] sm:$0xff]   ;;  %v10_v37 = vstv %s503_s4  ;;  %vm240_vm1 = vcmask 1024  }
   0x2   :  { %364 = vset.pattern.permute.xlu0 %v375_v2  ;;  %336 = vmatprep.subr.bf16.mxu1 %v376_v3  ;;  %v140_v6 = vld [vmem:[%s500_s2] sm:$0x3]  ;;  %v148_v8 = vld [vmem:[%s501_s3 + $0x8] sm:$0xff]  ;;  %v149_v9 = vld [vmem:[%s501_s3 + $0x10] sm:$0xff]  ;;  %11 = vst [vmem:[#allocation3] sm:$0x1] %v10_v37 }
   0x3   :  { %282 = vmatpush3.bf16.msra.mxu0 %v365_v1  ;;  %333 = vmatprep.mubr.msk.f32.mxu1 %vm374_vm0, %v373_v0  ;;  %v147_v7 = vld [vmem:[%s501_s3] sm:$0xff]  ;;  %v150_v10 = vld [vmem:[%s501_s3 + $0x18] sm:$0xff]  ;;  %v152_v15 = vld [vmem:[%s501_s3 + $0x28] sm:$0xff] }
   0x4   :  { %283 = vmatprep.subr.bf16.mxu0 %v373_v0  ;;  %143 = vperm.xlu0 %364, %v140_v6   ;;  %v368_v11 = vld [vmem:[%s499_s1 + $0x18] sm:$0xff]   ;;  %v337_v12 = vpack.c.bf16 %v148_v8, %v147_v7  ;;  %v340_v13 = vpack.c.bf16 %v150_v10, %v149_v9  ;;  %v151_v14 = vld [vmem:[%s501_s3 + $0x20] sm:$0xff]  ;;  %v153_v18 = vld [vmem:[%s501_s3 + $0x30] sm:$0xff] }
   0x5   :  { %v369_v16 = vld [vmem:[%s499_s1 + $0x20] sm:$0xff]   ;;  %v343_v17 = vpack.c.bf16 %v152_v15, %v151_v14  ;;  %v154_v19 = vld [vmem:[%s501_s3 + $0x38] sm:$0xff]  ;;  %v370_v20 = vld [vmem:[%s499_s1 + $0x28] sm:$0xff]  }
   0x6   :  { %338 = vmatpush3.bf16.msra.mxu1 %v337_v12  ;;  %v346_v21 = vpack.c.bf16 %v154_v19, %v153_v18  ;;  %v155_v22 = vld [vmem:[%s501_s3 + $0x40] sm:$0xff]  ;;  %v156_v23 = vld [vmem:[%s501_s3 + $0x48] sm:$0xff]  ;;  %v371_v24 = vld [vmem:[%s499_s1 + $0x30] sm:$0xff]  }
   0x7   :  { %284 = vmatpush3.bf16.msra.mxu0 %v366_v4  ;;  %339 = vmatprep.subr.bf16.mxu1 %v376_v3  ;;  %v349_v25 = vpack.c.bf16 %v156_v23, %v155_v22  ;;  %v372_v26 = vld [vmem:[%s499_s1 + $0x38] sm:$0xff]   ;;  %v29_v27 = vld [vmem:[%s502_s0] sm:$0x1]  ;;  %v157_v28 = vld [vmem:[%s501_s3 + $0x50] sm:$0xff] }
   0x8   :  { %285 = vmatprep.subr.bf16.mxu0 %v373_v0  ;;  %v158_v29 = vld [vmem:[%s501_s3 + $0x58] sm:$0xff]  ;;  %v159_v31 = vld [vmem:[%s501_s3 + $0x60] sm:$0xff]  ;;  %v160_v32 = vld [vmem:[%s501_s3 + $0x68] sm:$0xff] }
   0x9   :  { %v352_v30 = vpack.c.bf16 %v158_v29, %v157_v28  ;;  %v161_v33 = vld [vmem:[%s501_s3 + $0x70] sm:$0xff]  ;;  %v355_v34 = vpack.c.bf16 %v160_v32, %v159_v31  ;;  %v162_v35 = vld [vmem:[%s501_s3 + $0x78] sm:$0xff]  ;;  %v28_v38 = vld [vmem:[#allocation2] sm:$0x3] }
   0xa   :  { %341 = vmatpush3.bf16.msra.mxu1 %v340_v13  ;;  %v358_v36 = vpack.c.bf16 %v162_v35, %v161_v33  ;;  %v254_v47 = vld [vmem:[#allocation3] ss:$0 sm:$0xff] }
   0xb   :  { %286 = vmatpush3.bf16.msra.mxu0 %v367_v5  ;;  %342 = vmatprep.subr.bf16.mxu1 %v376_v3 }
   0xc   :  { %287 = vmatprep.subr.bf16.mxu0 %v373_v0 }
   0xe   :  { %344 = vmatpush3.bf16.msra.mxu1 %v343_v17 }
   0xf   :  { %288 = vmatpush3.bf16.msra.mxu0 %v368_v11  ;;  %345 = vmatprep.subr.bf16.mxu1 %v376_v3 }
  0x10   :  { %289 = vmatprep.subr.bf16.mxu0 %v373_v0 }
  0x12   :  { %347 = vmatpush3.bf16.msra.mxu1 %v346_v21 }
  0x13   :  { %290 = vmatpush3.bf16.msra.mxu0 %v369_v16  ;;  %348 = vmatprep.subr.bf16.mxu1 %v376_v3 }
  0x14   :  { %291 = vmatprep.subr.bf16.mxu0 %v373_v0 }
  0x16   :  { %350 = vmatpush3.bf16.msra.mxu1 %v349_v25 }
  0x17   :  { %292 = vmatpush3.bf16.msra.mxu0 %v370_v20  ;;  %351 = vmatprep.subr.bf16.mxu1 %v376_v3 }
  0x18   :  { %293 = vmatprep.subr.bf16.mxu0 %v373_v0 }
  0x1a   :  { %353 = vmatpush3.bf16.msra.mxu1 %v352_v30 }
  0x1b   :  { %294 = vmatpush3.bf16.msra.mxu0 %v371_v24  ;;  %354 = vmatprep.subr.bf16.mxu1 %v376_v3 }
  0x1c   :  { %295 = vmatprep.subr.bf16.mxu0 %v373_v0 }
  0x1e   :  { %356 = vmatpush3.bf16.msra.mxu1 %v355_v34 }
  0x1f   :  { %296 = vmatpush3.bf16.msra.mxu0 %v372_v26  ;;  %357 = vmatprep.subr.bf16.mxu1 %v376_v3 }
  0x22   :  { %298 = vmatmul.mubr.bf16.vlgmr.msra.gmra.mrb[0].mxu0 %v29_v27  ;;  %359 = vmatpush3.bf16.msra.mxu1 %v358_v36 }
  0x83   :  { %v144_v44 = vpop.permute.xlu0 %143 }
  0xf5   :  { %v128_v39 = vpop.f32.mrb[0].mxu0 }
  0xf6   :  { %v134_v40 = vadd.f32 %v128_v39, %v28_v38  ;;  %v299_v41 = vpop.f32.mrb[1].mxu0 }
  0xf7   :  { %v131_v42 = vpop.f32.mrb[2].mxu0 }
  0xf8   :  { %135 = vst [vmem:[#allocation2] sm:$0x3] %v134_v40  ;;  %v300_v43 = vpop.f32.mrb[3].mxu0 }
  0xff   :  { %v139_v45 = vld [vmem:[#allocation2] sm:$0x3] }
 0x100   :  { %v146_v46 = vmul.f32 %v144_v44, %v139_v45 }
 0x102   :  { %334 = vmatmul.mubr.f32.vlgmr.msra.gmra.mrb[0].mxu1 %v146_v46 }
 0x1d5   :  { %v236_v48 = vpop.f32.mrb[0].mxu1 }
 0x1d6   :  { %v237_v49 = vadd.f32 %v254_v47, %v236_v48  ;;  %v335_v50 = vpop.f32.mrb[1].mxu1 }
 0x1d8   :  { %241 = vst.msk [vmem:[%s504_s5] sm:$0x3] %vm240_vm1, %v237_v49 }

// kernel: protein_dna_gnn_forward.4
= control target key start
LH: loop header
LB: loop body
LE: loop exit
PB: predicated region body
PF: predicated region fallthrough
CT: control target
= control target key end

     0   :  { %s1777_s0 = inlined_call_operand.vmem [shape: s32[2], index: 0, kind: input, shape index: {}]   ;;  %s1778_s2 = inlined_call_operand.vmem [shape: bf16[128,128], index: 2, kind: input, shape index: {}]   ;;  %s1779_s3 = inlined_call_operand.vmem [shape: bf16[128,128], index: 3, kind: input, shape index: {}]   ;;  %s1780_s4 = inlined_call_operand.vmem [shape: f32[128,128], index: 4, kind: input, shape index: {}]   ;;  %s1781_s5 = inlined_call_operand.vmem [shape: f32[1,128], index: 5, kind: input, shape index: {}]   ;;  %s1782_s6 = inlined_call_operand.vmem [shape: f32[128,1], index: 6, kind: input, shape index: {}, may-alias: {6,7}]   ;;  %s1783_s7 = inlined_call_operand.vmem [shape: f32[128,1], index: 7, kind: input, shape index: {}, may-alias: {6,7}]   ;;  %s1784_s8 = inlined_call_operand.vmem [shape: bf16[128,128], index: 8, kind: output, shape index: {}]   ;;  %s1785_s1 = inlined_call_operand.vmem [shape: s32[2], index: 1, kind: input, shape index: {}]  }
   0x1   :  { %s13_s29 = sshll.u32 %s1777_s0, 4  ;;  %s17_s10 = sshll.u32 %s1785_s1, 4  ;;  %s14_s29 = int_to_ptr.vmem [resolvable:$true] %s13_s29  ;;  %s18_s10 = int_to_ptr.vmem [resolvable:$true] %s17_s10 }
   0x2   :  { %s1495_s11 = scalar_lea.vmem %s14_s29, 16  ;;  %p1500_p1 = scmp.lt.s32.totalorder %s14_s29, %s14_s29 }
   0x3   :  { %p1496_p0 = scmp.ne.s32.totalorder %s14_s29, %s1495_s11  ;;  %p1501_p2 = scmp.lt.s32.totalorder %s1495_s11, %s1495_s11 }
   0x5   :  { %p1502_p3 = por %p1501_p2, %p1500_p1 }
   0x7   :  { %p1503_p4 = pnand %p1502_p3, %p1496_p0 }
   0x9   :  { %1506 = shalt.err (!%p1503_p4)  }
   0xa   :  { %s1545_s12 = smov [#allocation4]   ;;  %s1507_s13 = scalar_lea.vmem %s18_s10, 16 }
   0xb   :  { %16 = dma.vmem_to_smem %s14_s29, 16, %s1545_s12, [#allocation3] }
   0xc   :  { %p1508_p5 = scmp.ne.s32.totalorder %s18_s10, %s1507_s13  ;;  %p1512_p6 = scmp.lt.s32.totalorder %s18_s10, %s18_s10 }
   0xd   :  { %p1513_p7 = scmp.lt.s32.totalorder %s1507_s13, %s1507_s13 }
   0xf   :  { %p1514_p8 = por %p1513_p7, %p1512_p6 }
  0x11   :  { %p1515_p9 = pnand %p1514_p8, %p1508_p5 }
  0x13   :  { %1518 = shalt.err (!%p1515_p9)  }
  0x14   :  { %s1546_s0 = smov [#allocation5]  }
  0x15   :  { %20 = dma.vmem_to_smem %s18_s10, 16, %s1546_s0, [#allocation3] }
  0x16   :  { %1531 = dma.done.wait [#allocation3], 32 }
  0x17   :  { %1532 = vsyncadd [#allocation3], 4294967264 }
  0x18   :  { %22 = sfence }
  0x19   :  { %s1601_s1 = smov 0   ;;  %s1603_s14 = smov 0  }
  0x1a   :  { %s1605_s15 = smov 0  }
  0x1b LB: > { %s40_s16 = sadd.s32 1, %s1539_s14  ;;  %p1189_p10 = scmp.ge.s32.totalorder %s1543_s15, 1  ;;  %s1543_s15 = sphi %s1605_s15, %s28_s15   ;;  %s1539_s14 = sphi %s1603_s14, %s1787_s14   ;;  %s1535_s1 = sphi %s1601_s1, %s1786_s1  }
  0x1c   : > { %p42_p11 = scmp.ge.s32.totalorder %s40_s16, 2  ;;  %p347_p12 = scmp.lt.s32.totalorder %s1543_s15, 3 }
  0x1e   : > { %s1789_s16 = smov (%p42_p11, %s40_s16), 0  ;;  %p348_p13 = pnand %p1189_p10, %p347_p12 }
  0x1f   : > { %s413_s17 = sld [smem:[#allocation5 + %s1535_s1]] (!%p348_p13)  ;;  %s1191_s18 = sshll.u32 (!%p348_p13), %s1535_s1, 3  ;;  %v1547_v0 = vmov (!%p348_p13), 0.0  }
  0x20   : > { %351 = sbr.rel (%p348_p13) target bundleno = 812 (0x32c), region = 44  ;;  %s434_s19 = sld [smem:[#allocation5 + %s1535_s1]] (!%p348_p13)  ;;  %487 = vst [vmem:[#allocation2] sm:$0xff] (!%p348_p13), %v1547_v0  ;;  %488 = vst [vmem:[#allocation2 + $0x8] sm:$0xff] (!%p348_p13), %v1547_v0 }
  0x21   : > { %489 = vst [vmem:[#allocation2 + $0x10] sm:$0xff] (!%p348_p13), %v1547_v0  ;;  %490 = vst [vmem:[#allocation2 + $0x18] sm:$0xff] (!%p348_p13), %v1547_v0  ;;  %s416_s20 = sld [smem:[#allocation4 + %s1535_s1]] (!%p348_p13)  ;;  %p420_p0 = scmp.lt.s32.totalorder (!%p348_p13), %s1191_s18, 15 }
  0x22   : > { %491 = vst [vmem:[#allocation2 + $0x20] sm:$0xff] (!%p348_p13), %v1547_v0  ;;  %492 = vst [vmem:[#allocation2 + $0x28] sm:$0xff] (!%p348_p13), %v1547_v0  ;;  %s437_s21 = sld [smem:[#allocation4 + %s1535_s1]] (!%p348_p13) }
  0x23   : > { %493 = vst [vmem:[#allocation2 + $0x30] sm:$0xff] (!%p348_p13), %v1547_v0  ;;  %494 = vst [vmem:[#allocation2 + $0x38] sm:$0xff] (!%p348_p13), %v1547_v0  ;;  %s458_s22 = sld [smem:[#allocation5 + %s1535_s1]] (!%p348_p13) }
  0x24   : > { %s495_s23 = sld [smem:[#allocation4 + %s1535_s1]] (!%p348_p13) }
  0x25   : > { %s497_s24 = sld [smem:[#allocation5 + %s1535_s1]] (!%p348_p13)  ;;  %p1190_p1 = scmp.gt.s32.totalorder (!%p348_p13), %s413_s17, 0 }
  0x26   : > { %p1193_p2 = scmp.gt.s32.totalorder (!%p348_p13), %s434_s19, 0  ;;  %s461_s29 = sld [smem:[#allocation4 + %s1535_s1]] (!%p348_p13) }
  0x27   : > { %s1791_s18 = smov (!%p420_p0, %s1191_s18), 15  ;;  %s1793_s17 = smov (%p1190_p1, %s413_s17), 0 }
  0x28   : > { %s1197_s25 = sshll.u32 %s1791_s18, 3  ;;  %s1795_s19 = smov (%p1193_p2, %s434_s19), 0 }
  0x29   : > { %s1632_s28 = scalar_lea.vmem %s1782_s6, %s1197_s25  ;;  %p417_p3 = scmp.gt.s32.totalorder %s1793_s17, %s416_s20 }
  0x2a   : > { %p438_p4 = scmp.gt.s32.totalorder %s1795_s19, %s437_s21  ;;  %s1202_s30 = sshll.u32 %s1791_s18, 2 }
  0x2b   : > { %s1797_s17 = smov (!%p417_p3, %s1793_s17), %s416_s20  ;;  %s1638_s11 = scalar_lea.vmem %s1784_s8, %s1202_s30 }
  0x2c   : > { %s1799_s19 = smov (!%p438_p4, %s1795_s19), %s437_s21  ;;  %p422_p5 = scmp.lt.s32.totalorder %s1797_s17, 0 }
  0x2d   : > { %s1194_s12 = sshll.u32 %s1799_s19, 4  ;;  %p1203_p6 = scmp.le.s32.totalorder %s495_s23, 0 }
  0x2e   : > { %s1801_s17 = smov (!%p422_p5, %s1797_s17), 0  ;;  %p441_p7 = scmp.lt.s32.totalorder %s1194_s12, 15 }
  0x2f   : > { %p1204_p8 = scmp.ge.s32.totalorder %s497_s24, 0  ;;  %s424_s13 = sadd.s32 %s1801_s17, %s1791_s18 }
  0x30   : > { %p1198_p9 = scmp.gt.s32.totalorder %s458_s22, 0  ;;  %s1192_s0 = sshll.u32 %s424_s13, 2 }
  0x31   : > { %p499_p10 = pnand %p1204_p8, %p1203_p6  ;;  %s1643_s20 = scalar_lea.vmem %s1778_s2, %s1192_s0 }
  0x32   : > { %s1803_s12 = smov (!%p441_p7, %s1194_s12), 15  ;;  %s1805_s22 = smov (%p1198_p9, %s458_s22), 0 }
  0x33   : > { %s1195_s21 = sshll.u32 %s1803_s12, 2  ;;  %p462_p11 = scmp.gt.s32.totalorder %s1805_s22, %s461_s29  ;;  %v1548_v3 = vmov (!%p499_p10), 0   ;;  %v1489_v18 = vld [vmem:[%s1643_s20] sm:$0xff] (!%p499_p10)   ;;  %v1490_v19 = vld [vmem:[%s1643_s20 + $0x10] sm:$0xff] (!%p499_p10)  }
  0x34   : > { %s1648_s19 = scalar_lea.vmem %s1779_s3, %s1195_s21  ;;  %1488 = vset.pattern.permute.xlu1 (!%p499_p10), %v1548_v3  ;;  %1487 = vset.pattern.permute.xlu0 (!%p499_p10), %v1548_v3 }
  0x35   : > { %s1807_s22 = smov (!%p462_p11, %s1805_s22), %s461_s29  ;;  %502 = sbr.rel (%p499_p10) target bundleno = 447 (0x1bf), region = 52 }
  0x36   : > { %s1199_s23 = sshll.u32 %s1807_s22, 4  ;;  %1342 = vmatprep.mubr.bf16.mxu0 (!%p499_p10), %v1489_v18  ;;  %1346 = vmatprep.mubr.bf16.mxu1 (!%p499_p10), %v1490_v19  ;;  %v1280_v20 = vld [vmem:[%s1648_s19 + $0x8] sm:$0xff] (!%p499_p10)   ;;  %v1229_v21 = vld [vmem:[%s1648_s19] sm:$0xff] (!%p499_p10)   ;;  %v1281_v28 = vld [vmem:[%s1648_s19 + $0x10] sm:$0xff] (!%p499_p10)  }
  0x37   : > { %p465_p12 = scmp.lt.s32.totalorder %s1199_s23, 15  ;;  %v1234_v24 = vunpack.c.l.bf16 (!%p499_p10), %v1280_v20  ;;  %v1230_v25 = vunpack.c.l.bf16 (!%p499_p10), %v1229_v21  ;;  %v1235_v26 = vunpack.c.h.bf16 (!%p499_p10), %v1280_v20  ;;  %v1231_v27 = vunpack.c.h.bf16 (!%p499_p10), %v1229_v21  ;;  %v1282_v37 = vld [vmem:[%s1648_s19 + $0x18] sm:$0xff] (!%p499_p10)   ;;  %v1283_v46 = vld [vmem:[%s1648_s19 + $0x20] sm:$0xff] (!%p499_p10)   ;;  %v1284_v54 = vld [vmem:[%s1648_s19 + $0x28] sm:$0xff] (!%p499_p10)  }
  0x38   : > { %v1239_v31 = vunpack.c.h.bf16 (!%p499_p10), %v1281_v28  ;;  %v1238_v32 = vunpack.c.l.bf16 (!%p499_p10), %v1281_v28  ;;  %v1243_v41 = vunpack.c.h.bf16 (!%p499_p10), %v1282_v37  ;;  %v1242_v45 = vunpack.c.l.bf16 (!%p499_p10), %v1282_v37  ;;  %v1285_v62 = vld [vmem:[%s1648_s19 + $0x30] sm:$0xff] (!%p499_p10)   ;;  %v1491_v20 = vld [vmem:[%s1643_s20 + $0x8] sm:$0xff] (!%p499_p10)   ;;  %v1492_v21 = vld [vmem:[%s1643_s20 + $0x18] sm:$0xff] (!%p499_p10)  }
  0x39   : > { %s1809_s23 = smov (!%p465_p12, %s1199_s23), 15  ;;  %v1247_v49 = vunpack.c.h.bf16 (!%p499_p10), %v1283_v46  ;;  %v1246_v53 = vunpack.c.l.bf16 (!%p499_p10), %v1283_v46  ;;  %v1251_v57 = vunpack.c.h.bf16 (!%p499_p10), %v1284_v54  ;;  %v1250_v61 = vunpack.c.l.bf16 (!%p499_p10), %v1284_v54  ;;  %v658_v28 = vld [vmem:[#allocation2 + $0x18] sm:$0xff] (!%p499_p10) }
  0x3a   : > { %s1200_s17 = sshll.u32 %s1809_s23, 3 }
  0x3b   : > { %s1653_s30 = scalar_lea.vmem %s1783_s7, %s1200_s17 }
  0x3c   : > { %v521_v1 = vld [vmem:[%s1653_s30 + $0x10] sm:$0xff]  ;;  %v519_v2 = vld [vmem:[%s1653_s30] sm:$0xff]  ;;  %v522_v4 = vld [vmem:[%s1653_s30 + $0x18] sm:$0xff] }
  0x3d   : > { %563 = vperm.xlu1 %1488, %v521_v1   ;;  %553 = vperm.xlu0 %1487, %v519_v2   ;;  %v520_v5 = vld [vmem:[%s1653_s30 + $0x8] sm:$0xff]  ;;  %v523_v7 = vld [vmem:[%s1653_s30 + $0x20] sm:$0xff]  ;;  %v526_v8 = vld [vmem:[%s1653_s30 + $0x38] sm:$0xff]  ;;  %v1255_v1 = vunpack.c.h.bf16 %v1285_v62 }
  0x3e   : > { %v524_v6 = vld [vmem:[%s1653_s30 + $0x28] sm:$0xff]  ;;  %v525_v9 = vld [vmem:[%s1653_s30 + $0x30] sm:$0xff]  ;;  %v527_v11 = vld [vmem:[%s1653_s30 + $0x40] sm:$0xff] }
  0x3f   : > { %v528_v10 = vld [vmem:[%s1653_s30 + $0x48] sm:$0xff]  ;;  %v530_v12 = vld [vmem:[%s1653_s30 + $0x58] sm:$0xff]  ;;  %v529_v13 = vld [vmem:[%s1653_s30 + $0x50] sm:$0xff] }
  0x40   : > { %v532_v14 = vld [vmem:[%s1653_s30 + $0x68] sm:$0xff]  ;;  %v531_v15 = vld [vmem:[%s1653_s30 + $0x60] sm:$0xff]  ;;  %v534_v16 = vld [vmem:[%s1653_s30 + $0x78] sm:$0xff] }
  0x41   : > { %568 = vperm.xlu1 %1488, %v522_v4   ;;  %558 = vperm.xlu0 %1487, %v520_v5   ;;  %v533_v17 = vld [vmem:[%s1653_s30 + $0x70] sm:$0xff]  ;;  %v1254_v5 = vunpack.c.l.bf16 %v1285_v62 }
  0x45   : > { %578 = vperm.xlu1 %1488, %v524_v6   ;;  %573 = vperm.xlu0 %1487, %v523_v7   ;;  %v1286_v6 = vld [vmem:[%s1648_s19 + $0x38] sm:$0xff]  }
  0x49   : > { %588 = vperm.xlu1 %1488, %v526_v8   ;;  %583 = vperm.xlu0 %1487, %v525_v9   ;;  %v1259_v9 = vunpack.c.h.bf16 %v1286_v6 }
  0x4d   : > { %598 = vperm.xlu1 %1488, %v528_v10   ;;  %593 = vperm.xlu0 %1487, %v527_v11  }
  0x51   : > { %608 = vperm.xlu1 %1488, %v530_v12   ;;  %603 = vperm.xlu0 %1487, %v529_v13   ;;  %v1258_v13 = vunpack.c.l.bf16 %v1286_v6 }
  0x55   : > { %618 = vperm.xlu1 %1488, %v532_v14   ;;  %613 = vperm.xlu0 %1487, %v531_v15  }
  0x59   : > { %628 = vperm.xlu1 %1488, %v534_v16   ;;  %623 = vperm.xlu0 %1487, %v533_v17  }
  0xbc   : > { %v564_v22 = vpop.permute.xlu1 %563  ;;  %v554_v23 = vpop.permute.xlu0 %553 }
  0xbd   : > { %v633_v33 = vmul.f32 %v1234_v24, %v564_v22  ;;  %v631_v34 = vmul.f32 %v1230_v25, %v554_v23  ;;  %v657_v22 = vld [vmem:[#allocation2 + $0x10] sm:$0xff]  ;;  %v655_v24 = vld [vmem:[#allocation2] sm:$0xff] }
  0xbe   : > { %v661_v23 = vld [vmem:[#allocation2 + $0x30] sm:$0xff]  ;;  %v659_v25 = vld [vmem:[#allocation2 + $0x20] sm:$0xff] }
  0xc0   : > { %v569_v29 = vpop.permute.xlu1 %568  ;;  %v559_v30 = vpop.permute.xlu0 %558 }
  0xc1   : > { %v634_v35 = vmul.f32 %v1235_v26, %v569_v29  ;;  %v632_v36 = vmul.f32 %v1231_v27, %v559_v30  ;;  %v662_v29 = vld [vmem:[#allocation2 + $0x38] sm:$0xff] }
  0xc3   : > { %v647_v38 = vpack.c.bf16 %v632_v36, %v631_v34  ;;  %v648_v42 = vpack.c.bf16 %v634_v35, %v633_v33  ;;  %v656_v34 = vld [vmem:[#allocation2 + $0x8] sm:$0xff] }
  0xc4   : > { %v579_v39 = vpop.permute.xlu1 %578  ;;  %v574_v40 = vpop.permute.xlu0 %573  ;;  %v660_v35 = vld [vmem:[#allocation2 + $0x28] sm:$0xff] }
  0xc5   : > { %v636_v43 = vmul.f32 %v1239_v31, %v579_v39  ;;  %v635_v44 = vmul.f32 %v1238_v32, %v574_v40  ;;  %1326 = vmatprep.subr.bf16.mxu0 %v647_v38  ;;  %1426 = vmatprep.subr.bf16.mxu1 %v647_v38 }
  0xc6   : > { %1327 = vmatpush3.bf16.msra.mxu0 %v647_v38  ;;  %1434 = vmatpush3.bf16.msra.mxu1 %v647_v38 }
  0xc7   : > { %1328 = vmatprep.subr.bf16.mxu0 %v648_v42  ;;  %1427 = vmatprep.subr.bf16.mxu1 %v648_v42  ;;  %v649_v50 = vpack.c.bf16 %v636_v43, %v635_v44 }
  0xc8   : > { %v589_v47 = vpop.permute.xlu1 %588  ;;  %v584_v48 = vpop.permute.xlu0 %583 }
  0xc9   : > { %v638_v51 = vmul.f32 %v1243_v41, %v589_v47  ;;  %v637_v52 = vmul.f32 %v1242_v45, %v584_v48 }
  0xca   : > { %1329 = vmatpush3.bf16.msra.mxu0 %v648_v42  ;;  %1435 = vmatpush3.bf16.msra.mxu1 %v648_v42 }
  0xcb   : > { %1330 = vmatprep.subr.bf16.mxu0 %v649_v50  ;;  %1428 = vmatprep.subr.bf16.mxu1 %v649_v50  ;;  %v650_v58 = vpack.c.bf16 %v638_v51, %v637_v52 }
  0xcc   : > { %v599_v55 = vpop.permute.xlu1 %598  ;;  %v594_v56 = vpop.permute.xlu0 %593 }
  0xcd   : > { %v640_v59 = vmul.f32 %v1247_v49, %v599_v55  ;;  %v639_v60 = vmul.f32 %v1246_v53, %v594_v56 }
  0xce   : > { %1331 = vmatpush3.bf16.msra.mxu0 %v649_v50  ;;  %1436 = vmatpush3.bf16.msra.mxu1 %v649_v50 }
  0xcf   : > { %1332 = vmatprep.subr.bf16.mxu0 %v650_v58  ;;  %1429 = vmatprep.subr.bf16.mxu1 %v650_v58  ;;  %v651_v2 = vpack.c.bf16 %v640_v59, %v639_v60 }
  0xd0   : > { %v609_v63 = vpop.permute.xlu1 %608  ;;  %v604_v0 = vpop.permute.xlu0 %603 }
  0xd1   : > { %v642_v3 = vmul.f32 %v1251_v57, %v609_v63  ;;  %v641_v4 = vmul.f32 %v1250_v61, %v604_v0 }
  0xd2   : > { %1333 = vmatpush3.bf16.msra.mxu0 %v650_v58  ;;  %1437 = vmatpush3.bf16.msra.mxu1 %v650_v58 }
  0xd3   : > { %1334 = vmatprep.subr.bf16.mxu0 %v651_v2  ;;  %1430 = vmatprep.subr.bf16.mxu1 %v651_v2  ;;  %v652_v10 = vpack.c.bf16 %v642_v3, %v641_v4 }
  0xd4   : > { %v619_v7 = vpop.permute.xlu1 %618  ;;  %v614_v8 = vpop.permute.xlu0 %613 }
  0xd5   : > { %v644_v11 = vmul.f32 %v1255_v1, %v619_v7  ;;  %v643_v12 = vmul.f32 %v1254_v5, %v614_v8 }
  0xd6   : > { %1335 = vmatpush3.bf16.msra.mxu0 %v651_v2  ;;  %1438 = vmatpush3.bf16.msra.mxu1 %v651_v2 }
  0xd7   : > { %1336 = vmatprep.subr.bf16.mxu0 %v652_v10  ;;  %1431 = vmatprep.subr.bf16.mxu1 %v652_v10  ;;  %v653_v16 = vpack.c.bf16 %v644_v11, %v643_v12 }
  0xd8   : > { %v629_v14 = vpop.permute.xlu1 %628  ;;  %v624_v15 = vpop.permute.xlu0 %623 }
  0xd9   : > { %v646_v17 = vmul.f32 %v1259_v9, %v629_v14  ;;  %v645_v18 = vmul.f32 %v1258_v13, %v624_v15 }
  0xda   : > { %1337 = vmatpush3.bf16.msra.mxu0 %v652_v10  ;;  %1439 = vmatpush3.bf16.msra.mxu1 %v652_v10 }
  0xdb   : > { %1338 = vmatprep.subr.bf16.mxu0 %v653_v16  ;;  %1432 = vmatprep.subr.bf16.mxu1 %v653_v16  ;;  %v654_v19 = vpack.c.bf16 %v646_v17, %v645_v18 }
  0xde   : > { %1339 = vmatpush3.bf16.msra.mxu0 %v653_v16  ;;  %1440 = vmatpush3.bf16.msra.mxu1 %v653_v16 }
  0xdf   : > { %1340 = vmatprep.subr.bf16.mxu0 %v654_v19  ;;  %1433 = vmatprep.subr.bf16.mxu1 %v654_v19 }
  0xe2   : > { %1341 = vmatpush3.bf16.msra.mxu0 %v654_v19  ;;  %1441 = vmatpush3.bf16.msra.mxu1 %v654_v19 }
  0xe5   : > { %1343 = vmatmul.mubr.bf16.vlgmr.msra.gmra.mrb[0].mxu0 %v1491_v20  ;;  %1347 = vmatmul.mubr.bf16.vlgmr.msra.gmra.mrb[0].mxu1 %v1492_v21 }
 0x1b8   : > { %v1344_v26 = vpop.f32.mrb[0].mxu0  ;;  %v1348_v27 = vpop.f32.mrb[0].mxu1 }
 0x1b9   : > { %v762_v30 = vadd.f32 %v1344_v26, %v657_v22  ;;  %v766_v31 = vadd.f32 %v1348_v27, %v661_v23  ;;  %v729_v32 = vpop.f32.mrb[1].mxu0  ;;  %v745_v33 = vpop.f32.mrb[1].mxu1 }
 0x1ba   : > { %v760_v36 = vadd.f32 %v729_v32, %v655_v24  ;;  %v764_v37 = vadd.f32 %v745_v33, %v659_v25  ;;  %v1345_v38 = vpop.f32.mrb[2].mxu0  ;;  %v1349_v39 = vpop.f32.mrb[2].mxu1 }
 0x1bb   : > { %770 = vst [vmem:[#allocation2 + $0x10] sm:$0xff] %v762_v30  ;;  %774 = vst [vmem:[#allocation2 + $0x30] sm:$0xff] %v766_v31  ;;  %v763_v40 = vadd.f32 %v1345_v38, %v658_v28  ;;  %v767_v41 = vadd.f32 %v1349_v39, %v662_v29  ;;  %v732_v42 = vpop.f32.mrb[3].mxu0  ;;  %v748_v43 = vpop.f32.mrb[3].mxu1 }
 0x1bc   : > { %768 = vst [vmem:[#allocation2] sm:$0xff] %v760_v36  ;;  %772 = vst [vmem:[#allocation2 + $0x20] sm:$0xff] %v764_v37  ;;  %v761_v44 = vadd.f32 %v732_v42, %v656_v34  ;;  %v765_v45 = vadd.f32 %v748_v43, %v660_v35 }
 0x1bd   : > { %771 = vst [vmem:[#allocation2 + $0x18] sm:$0xff] %v763_v40  ;;  %775 = vst [vmem:[#allocation2 + $0x38] sm:$0xff] %v767_v41 }
 0x1be   : > { %769 = vst [vmem:[#allocation2 + $0x8] sm:$0xff] %v761_v44  ;;  %773 = vst [vmem:[#allocation2 + $0x28] sm:$0xff] %v765_v45 }
 0x1bf PF: > { %v780_v46 = vld [vmem:[%s1632_s28 + $0x8] sm:$0xff]  ;;  %v779_v47 = vld [vmem:[%s1632_s28] sm:$0xff]  ;;  %v1549_v48 = vmov 0   ;;  %v845_v53 = vld [vmem:[%s1780_s4 + $0x10] sm:$0xff] }
 0x1c0   : > { %1494 = vset.pattern.permute.xlu1 %v1549_v48  ;;  %1493 = vset.pattern.permute.xlu0 %v1549_v48  ;;  %v1688_v49 = vld [vmem:[%s1632_s28 + $0x28] sm:$0xff]  ;;  %v1691_v50 = vld [vmem:[%s1632_s28 + $0x20] sm:$0xff]  ;;  %v846_v54 = vld [vmem:[%s1780_s4 + $0x18] sm:$0xff]  ;;  %vm980_vm0 = vcmp.gt.f32.partialorder %v780_v46, 0.0  ;;  %vm979_vm1 = vcmp.gt.f32.partialorder %v779_v47, 0.0 }
 0x1c1   : > { %802 = vperm.xlu1 %1494, %v780_v46   ;;  %797 = vperm.xlu0 %1493, %v779_v47   ;;  %v843_v51 = vld [vmem:[%s1780_s4] sm:$0xff]  ;;  %v844_v52 = vld [vmem:[%s1780_s4 + $0x8] sm:$0xff]  ;;  %v1398_v56 = vpack.c.bf16 %v846_v54, %v845_v53  ;;  %v1714_v59 = vld [vmem:[%s1632_s28 + $0x30] sm:$0xff]  ;;  %v988_v5 = vsel %vm980_vm0, 1, %v1549_v48  ;;  %v987_v6 = vsel %vm979_vm1, 1, %v1549_v48  ;;  %vm984_vm4 = vcmp.gt.f32.partialorder %v1688_v49, 0.0 }
 0x1c2   : > { %v1394_v55 = vpack.c.bf16 %v844_v52, %v843_v51  ;;  %v847_v57 = vld [vmem:[%s1780_s4 + $0x20] sm:$0xff]  ;;  %v848_v58 = vld [vmem:[%s1780_s4 + $0x28] sm:$0xff]  ;;  %v781_v60 = vld [vmem:[%s1632_s28 + $0x10] sm:$0xff]  ;;  %vm983_vm5 = vcmp.gt.f32.partialorder %v1691_v50, 0.0  ;;  %v992_v15 = vsel %vm984_vm4, 1, %v1549_v48  ;;  %vm985_vm7 = vcmp.gt.f32.partialorder %v1714_v59, 0.0 }
 0x1c3   : > { %v1402_v61 = vpack.c.bf16 %v848_v58, %v847_v57  ;;  %v849_v62 = vld [vmem:[%s1780_s4 + $0x30] sm:$0xff]  ;;  %v850_v63 = vld [vmem:[%s1780_s4 + $0x38] sm:$0xff]  ;;  %v851_v3 = vld [vmem:[%s1780_s4 + $0x40] sm:$0xff]  ;;  %vm981_vm3 = vcmp.gt.f32.partialorder %v781_v60, 0.0  ;;  %v991_v16 = vsel %vm983_vm5, 1, %v1549_v48  ;;  %v993_v21 = vsel %vm985_vm7, 1, %v1549_v48 }
 0x1c4   : > { %1395 = vmatprep.subr.bf16.mxu0 %v1394_v55  ;;  %1442 = vmatprep.subr.bf16.mxu1 %v1394_v55  ;;  %v786_v0 = vld [vmem:[%s1632_s28 + $0x38] sm:$0xff]  ;;  %v1406_v2 = vpack.c.bf16 %v850_v63, %v849_v62  ;;  %v852_v4 = vld [vmem:[%s1780_s4 + $0x48] sm:$0xff]  ;;  %v853_v8 = vld [vmem:[%s1780_s4 + $0x50] sm:$0xff]  ;;  %v989_v11 = vsel %vm981_vm3, 1, %v1549_v48 }
 0x1c5   : > { %822 = vperm.xlu1 %1494, %v1688_v49   ;;  %817 = vperm.xlu0 %1493, %v1691_v50   ;;  %v782_v1 = vld [vmem:[%s1632_s28 + $0x18] sm:$0xff]  ;;  %v1410_v7 = vpack.c.bf16 %v852_v4, %v851_v3  ;;  %v855_v13 = vld [vmem:[%s1780_s4 + $0x60] sm:$0xff]  ;;  %v856_v14 = vld [vmem:[%s1780_s4 + $0x68] sm:$0xff]  ;;  %vm986_vm6 = vcmp.gt.f32.partialorder %v786_v0, 0.0 }
 0x1c6   : > { %1397 = vmatpush3.bf16.msra.mxu0 %v1394_v55  ;;  %1450 = vmatpush3.bf16.msra.mxu1 %v1394_v55  ;;  %vm982_vm2 = vcmp.gt.f32.partialorder %v782_v1, 0.0  ;;  %v854_v9 = vld [vmem:[%s1780_s4 + $0x58] sm:$0xff]  ;;  %v1418_v17 = vpack.c.bf16 %v856_v14, %v855_v13  ;;  %v857_v18 = vld [vmem:[%s1780_s4 + $0x70] sm:$0xff]  ;;  %v994_v20 = vsel %vm986_vm6, 1, %v1549_v48  ;;  %v788_v23 = vld [vmem:[#allocation2 + $0x8] sm:$0xff] }
 0x1c7   : > { %1399 = vmatprep.subr.bf16.mxu0 %v1398_v56  ;;  %1443 = vmatprep.subr.bf16.mxu1 %v1398_v56  ;;  %v990_v10 = vsel %vm982_vm2, 1, %v1549_v48  ;;  %v1414_v12 = vpack.c.bf16 %v854_v9, %v853_v8  ;;  %v858_v19 = vld [vmem:[%s1780_s4 + $0x78] sm:$0xff]  ;;  %v787_v24 = vld [vmem:[#allocation2] sm:$0xff]  ;;  %v792_v29 = vld [vmem:[#allocation2 + $0x28] sm:$0xff] }
 0x1c8   : > { %v1422_v22 = vpack.c.bf16 %v858_v19, %v857_v18  ;;  %v791_v30 = vld [vmem:[#allocation2 + $0x20] sm:$0xff]  ;;  %v793_v35 = vld [vmem:[#allocation2 + $0x30] sm:$0xff]  ;;  %v794_v41 = vld [vmem:[#allocation2 + $0x38] sm:$0xff] }
 0x1c9   : > { %827 = vperm.xlu1 %1494, %v1714_v59   ;;  %807 = vperm.xlu0 %1493, %v781_v60   ;;  %v789_v36 = vld [vmem:[#allocation2 + $0x10] sm:$0xff]  ;;  %v790_v42 = vld [vmem:[#allocation2 + $0x18] sm:$0xff]  ;;  %v1209_v50 = vld [vmem:[%s1781_s5] ss:$0 sm:$0xff] }
 0x1ca   : > { %1401 = vmatpush3.bf16.msra.mxu0 %v1398_v56  ;;  %1451 = vmatpush3.bf16.msra.mxu1 %v1398_v56 }
 0x1cb   : > { %1403 = vmatprep.subr.bf16.mxu0 %v1402_v61  ;;  %1444 = vmatprep.subr.bf16.mxu1 %v1402_v61 }
 0x1cd   : > { %832 = vperm.xlu1 %1494, %v786_v0   ;;  %812 = vperm.xlu0 %1493, %v782_v1  }
 0x1ce   : > { %1405 = vmatpush3.bf16.msra.mxu0 %v1402_v61  ;;  %1452 = vmatpush3.bf16.msra.mxu1 %v1402_v61 }
 0x1cf   : > { %1407 = vmatprep.subr.bf16.mxu0 %v1406_v2  ;;  %1445 = vmatprep.subr.bf16.mxu1 %v1406_v2 }
 0x1d1   : > { %999 = vperm.xlu1 %1494, %v988_v5   ;;  %996 = vperm.xlu0 %1493, %v987_v6  }
 0x1d2   : > { %1409 = vmatpush3.bf16.msra.mxu0 %v1406_v2  ;;  %1453 = vmatpush3.bf16.msra.mxu1 %v1406_v2 }
 0x1d3   : > { %1411 = vmatprep.subr.bf16.mxu0 %v1410_v7  ;;  %1446 = vmatprep.subr.bf16.mxu1 %v1410_v7 }
 0x1d5   : > { %1005 = vperm.xlu1 %1494, %v990_v10   ;;  %1002 = vperm.xlu0 %1493, %v989_v11  }
 0x1d6   : > { %1413 = vmatpush3.bf16.msra.mxu0 %v1410_v7  ;;  %1454 = vmatpush3.bf16.msra.mxu1 %v1410_v7 }
 0x1d7   : > { %1415 = vmatprep.subr.bf16.mxu0 %v1414_v12  ;;  %1447 = vmatprep.subr.bf16.mxu1 %v1414_v12 }
 0x1d9   : > { %1011 = vperm.xlu1 %1494, %v992_v15   ;;  %1008 = vperm.xlu0 %1493, %v991_v16  }
 0x1da   : > { %1417 = vmatpush3.bf16.msra.mxu0 %v1414_v12  ;;  %1455 = vmatpush3.bf16.msra.mxu1 %v1414_v12 }
 0x1db   : > { %1419 = vmatprep.subr.bf16.mxu0 %v1418_v17  ;;  %1448 = vmatprep.subr.bf16.mxu1 %v1418_v17 }
 0x1dd   : > { %1017 = vperm.xlu1 %1494, %v994_v20   ;;  %1014 = vperm.xlu0 %1493, %v993_v21  }
 0x1de   : > { %1421 = vmatpush3.bf16.msra.mxu0 %v1418_v17  ;;  %1456 = vmatpush3.bf16.msra.mxu1 %v1418_v17 }
 0x1df   : > { %1423 = vmatprep.subr.bf16.mxu0 %v1422_v22  ;;  %1449 = vmatprep.subr.bf16.mxu1 %v1422_v22 }
 0x1e2   : > { %1425 = vmatpush3.bf16.msra.mxu0 %v1422_v22  ;;  %1457 = vmatpush3.bf16.msra.mxu1 %v1422_v22 }
 0x240   : > { %v803_v25 = vpop.permute.xlu1 %802  ;;  %v798_v26 = vpop.permute.xlu0 %797 }
 0x241   : > { %v836_v27 = vmul.f32 %v803_v25, %v788_v23  ;;  %v835_v28 = vmul.f32 %v798_v26, %v787_v24 }
 0x243   : > { %1382 = vmatprep.mubr.f32.mxu0 %v835_v28 }
 0x244   : > { %v823_v31 = vpop.permute.xlu1 %822  ;;  %1383 = vmatmul.mubr.f32.vlgmr.msra.gmra.mrb[0].mxu0 %v836_v27  ;;  %v818_v32 = vpop.permute.xlu0 %817 }
 0x245   : > { %v840_v33 = vmul.f32 %v823_v31, %v792_v29  ;;  %v839_v34 = vmul.f32 %v818_v32, %v791_v30 }
 0x247   : > { %1388 = vmatprep.mubr.f32.mxu1 %v839_v34 }
 0x248   : > { %v828_v37 = vpop.permute.xlu1 %827  ;;  %1389 = vmatmul.mubr.f32.vlgmr.msra.gmra.mrb[0].mxu1 %v840_v33  ;;  %v808_v38 = vpop.permute.xlu0 %807 }
 0x249   : > { %v841_v39 = vmul.f32 %v828_v37, %v793_v35  ;;  %v837_v40 = vmul.f32 %v808_v38, %v789_v36 }
 0x24b   : > { %1385 = vmatprep.mubr.f32.mxu0 %v837_v40  ;;  %1391 = vmatprep.mubr.f32.mxu1 %v841_v39 }
 0x24c   : > { %v833_v43 = vpop.permute.xlu1 %832  ;;  %v813_v44 = vpop.permute.xlu0 %812 }
 0x24d   : > { %v842_v45 = vmul.f32 %v833_v43, %v794_v41  ;;  %v838_v46 = vmul.f32 %v813_v44, %v790_v42 }
 0x24f   : > { %1386 = vmatmul.mubr.f32.gmra.mrb[2].mxu0 %v838_v46  ;;  %1392 = vmatmul.mubr.f32.gmra.mrb[2].mxu1 %v842_v45 }
 0x250   : > { %v1000_v47 = vpop.permute.xlu1 %999  ;;  %v997_v48 = vpop.permute.xlu0 %996 }
 0x251   : > { %vm1020_vm8 = vcmp.eq.s32.totalorder %v1000_v47, 1  ;;  %vm1019_vm9 = vcmp.eq.s32.totalorder %v997_v48, 1 }
 0x254   : > { %v1006_v49 = vpop.permute.xlu1 %1005  ;;  %v1003_v51 = vpop.permute.xlu0 %1002 }
 0x255   : > { %vm1022_vm12 = vcmp.eq.s32.totalorder %v1006_v49, 1  ;;  %vm1021_vm14 = vcmp.eq.s32.totalorder %v1003_v51, 1 }
 0x258   : > { %v1012_v57 = vpop.permute.xlu1 %1011  ;;  %v1009_v63 = vpop.permute.xlu0 %1008 }
 0x259   : > { %vm1024_vm10 = vcmp.eq.s32.totalorder %v1012_v57, 1  ;;  %vm1023_vm11 = vcmp.eq.s32.totalorder %v1009_v63, 1 }
 0x25c   : > { %v1018_v6 = vpop.permute.xlu1 %1017  ;;  %v1015_v15 = vpop.permute.xlu0 %1014 }
 0x25d   : > { %vm1026_vm13 = vcmp.eq.s32.totalorder %v1018_v6, 1  ;;  %vm1025_vm15 = vcmp.eq.s32.totalorder %v1015_v15, 1 }
 0x317   : > { %v1384_v52 = vpop.f32.mrb[0].mxu0 }
 0x318   : > { %v938_v53 = vadd.f32 %v1384_v52, %v1209_v50  ;;  %v932_v54 = vpop.f32.mrb[1].mxu0 }
 0x319   : > { %v933_v55 = vadd.f32 %v1209_v50, %v932_v54 }
 0x31a   : > { %v972_v56 = vmax.f32 %v938_v53, 0.0 }
 0x31b   : > { %v971_v58 = vmax.f32 %v933_v55, 0.0  ;;  %v1390_v59 = vpop.f32.mrb[0].mxu1 }
 0x31c   : > { %v1028_v60 = vsel %vm1020_vm8, %v972_v56, 0.0  ;;  %v958_v61 = vadd.f32 %v1390_v59, %v1209_v50  ;;  %v952_v62 = vpop.f32.mrb[1].mxu1 }
 0x31d   : > { %v1027_v0 = vsel %vm1019_vm9, %v971_v58, 0.0  ;;  %v953_v1 = vadd.f32 %v1209_v50, %v952_v62 }
 0x31e   : > { %v1263_v2 = vpack.c.bf16 %v1028_v60, %v1027_v0  ;;  %v976_v3 = vmax.f32 %v958_v61, 0.0 }
 0x31f   : > { %v975_v4 = vmax.f32 %v953_v1, 0.0 }
 0x320   : > { %1264 = vst [vmem:[%s1638_s11] sm:$0xff] %v1263_v2   ;;  %v1032_v5 = vsel %vm1024_vm10, %v976_v3, 0.0 }
 0x321   : > { %v1031_v7 = vsel %vm1023_vm11, %v975_v4, 0.0 }
 0x322   : > { %v1273_v8 = vpack.c.bf16 %v1032_v5, %v1031_v7  ;;  %v1387_v9 = vpop.f32.mrb[2].mxu0  ;;  %v1393_v10 = vpop.f32.mrb[2].mxu1 }
 0x323   : > { %v948_v11 = vadd.f32 %v1387_v9, %v1209_v50  ;;  %v968_v12 = vadd.f32 %v1393_v10, %v1209_v50  ;;  %v942_v13 = vpop.f32.mrb[3].mxu0  ;;  %v962_v14 = vpop.f32.mrb[3].mxu1 }
 0x324   : > { %1288 = vst [vmem:[%s1638_s11 + $0x10] sm:$0xff] %v1273_v8   ;;  %v943_v16 = vadd.f32 %v1209_v50, %v942_v13  ;;  %v963_v17 = vadd.f32 %v1209_v50, %v962_v14 }
 0x325   : > { %v974_v18 = vmax.f32 %v948_v11, 0.0  ;;  %v978_v19 = vmax.f32 %v968_v12, 0.0 }
 0x326   : > { %v973_v20 = vmax.f32 %v943_v16, 0.0  ;;  %v977_v21 = vmax.f32 %v963_v17, 0.0 }
 0x327   : > { %v1030_v22 = vsel %vm1022_vm12, %v974_v18, 0.0  ;;  %v1034_v23 = vsel %vm1026_vm13, %v978_v19, 0.0 }
 0x328   : > { %v1029_v24 = vsel %vm1021_vm14, %v973_v20, 0.0  ;;  %v1033_v25 = vsel %vm1025_vm15, %v977_v21, 0.0 }
 0x329   : > { %v1268_v26 = vpack.c.bf16 %v1030_v22, %v1029_v24  ;;  %v1278_v27 = vpack.c.bf16 %v1034_v23, %v1033_v25 }
 0x32b   : > { %1287 = vst [vmem:[%s1638_s11 + $0x8] sm:$0xff] %v1268_v26   ;;  %1289 = vst [vmem:[%s1638_s11 + $0x18] sm:$0xff] %v1278_v27  }
 0x32c PF: > { %s28_s15 = sadd.s32 1, %s1543_s15   ;;  %s1786_s1 = smov %s1539_s14 }
 0x32d   : > { %p25_p13 = scmp.ge.s32.totalorder %s28_s15, 4   ;;  %s1787_s14 = smov %s1789_s16 }
 0x32f   :  { %27 = sbr.rel (!%p25_p13) target bundleno = 27 (0x1b), region = 95 }

</bundles_post_ra>
